<compile_context>
chip_gen: v7x
topology: tpu7x:2x2x1
jax: 0.10.0
libtpu: 0.0.40
codegen_flags: <defaults>
</compile_context>

<pallas_src>
import jax
import jax.numpy as jnp
from jax.experimental import pallas as pl
from jax.experimental.pallas import tpu as pltpu


def _round_up(x, m):
    return ((x + m - 1) // m) * m


def _sublane_tile(itemsize):
    # Sub-32-bit dtypes pack along sublanes.
    return {4: 8, 2: 16, 1: 32}.get(itemsize, 8)


def _tpu_budgets(block_budget_override=None):
    """(per-block byte budget, scoped vmem_limit_bytes), generation aware."""
    try:
        info = pltpu.get_tpu_info()
        vmem_cap = getattr(info, "vmem_capacity_bytes", 64 * 1024 * 1024)
    except Exception:  # pragma: no cover - conservative fallback
        vmem_cap = 64 * 1024 * 1024
    if vmem_cap >= 128 * 1024 * 1024:     # v5e / v6e (128 MiB physical VMEM)
        budget, limit = 8 * 1024 * 1024, 64 * 1024 * 1024
    else:                                  # v7x (64 MiB physical VMEM)
        budget, limit = 4 * 1024 * 1024, 32 * 1024 * 1024
    if block_budget_override is not None:
        budget = block_budget_override
    return budget, limit


def _choose_tiles(n, c, hw, in_dtype, out_dtype, budget):
    """Pick (TN batch rows, TC channel tile, THW lane tile)."""
    in_item = jnp.dtype(in_dtype).itemsize
    in_sub = _sublane_tile(in_item)
    out_sub = _sublane_tile(jnp.dtype(out_dtype).itemsize)
    # Budget with sublane padding of the (C, THW) slab; count 4 B/elem for
    # sub-32-bit floats (f32 accumulation headroom).
    widen = jnp.issubdtype(in_dtype, jnp.floating) and in_item < 4
    eff = 4 if widen else in_item
    c_pad = _round_up(c, in_sub)

    # We want at least min(n, out_sub) batch rows per block so the (TN, THW)
    # output block is sublane-dense; budget each row accordingly.
    rows_floor = min(n, out_sub)
    row_budget = max(1, budget // rows_floor)

    # Lane tile: multiple of 128, at most 2048 lanes, never wider than HW
    # (rounded up to a lane tile).  Shrink (not below 512) if one row's
    # (C_pad, THW) slab would exceed the per-row budget.
    thw = min(2048, _round_up(hw, 128))
    while thw > 512 and c_pad * eff * thw > row_budget:
        thw = max(512, (thw // 2) // 128 * 128)

    # Very deep C: tile the reduction axis instead of shrinking THW further.
    tc = c
    if c_pad * eff * thw > row_budget:
        max_tc = max(in_sub, (row_budget // (eff * thw)) // in_sub * in_sub)
        tc = min(c, max_tc)
    tc_pad = _round_up(tc, in_sub)
    row_bytes = tc_pad * eff * thw

    # Batch rows per block: whole batch if it fits, else a multiple of the
    # output sublane tile (keeps the (TN, THW) output block dense/lowerable).
    tn_cap = max(1, budget // row_bytes)
    if tn_cap >= n:
        tn = n
    else:
        tn = max(rows_floor, (tn_cap // out_sub) * out_sub)

    # v7x megacore: make sure the parallel grid has >= 2 steps when possible;
    # split the lane axis (keeps all block-shape constraints intact).
    if pl.cdiv(n, tn) * pl.cdiv(hw, thw) < 2 and thw > 128:
        thw = max(128, (thw // 2) // 128 * 128)

    return tn, tc, thw


def _make_direct_kernel(acc_dtype):
    def kernel(x_ref, o_ref):
        # x_ref: (TN, C, THW); o_ref: (TN, THW).
        # dtype= folds the widen into the reduce (no full-block f32 temp).
        o_ref[...] = jnp.sum(x_ref[...], axis=1, dtype=acc_dtype).astype(o_ref.dtype)

    return kernel


def _make_tiled_c_kernel(c_total, tc):
    def kernel(x_ref, o_ref, acc_ref):
        # x_ref: (TN, TC, THW); o_ref: (TN, THW); acc_ref: (TN, THW) f32/i32.
        k = pl.program_id(2)

        @pl.when(k == 0)
        def _():
            acc_ref[...] = jnp.zeros_like(acc_ref)

        x = x_ref[...]
        if c_total % tc != 0:
            # Last reduction block overhangs C: zero the out-of-bounds channel
            # rows so they don't contaminate the per-lane sums.
            ch = k * tc + jax.lax.broadcasted_iota(jnp.int32, x.shape, 1)
            x = jnp.where(ch < c_total, x, jnp.zeros_like(x))
        acc_ref[...] += jnp.sum(x, axis=1, dtype=acc_ref.dtype)

        @pl.when(k == pl.num_programs(2) - 1)
        def _():
            o_ref[...] = acc_ref[...].astype(o_ref.dtype)

    return kernel


def null_discriminator_forward(x, y=None, *, force_pallas=False,
                               block_budget_bytes=None):
    """NullDiscriminator.forward: sum over channels, keepdim=True.

    x: (N, C, H, W) -> (N, 1, H, W).  `y` is accepted and ignored (as in the
    PyTorch module).  For KB-scale inputs the pallas_call launch overhead
    dominates, so unless `force_pallas` a plain XLA reduce is used.
    """
    del y  # NullDiscriminator ignores the label input.
    n, c, h, w = x.shape
    hw = h * w

    if jnp.issubdtype(x.dtype, jnp.floating):
        out_dtype = x.dtype
        acc_dtype = jnp.float32          # accumulate bf16/fp16/fp8 in f32
    else:
        # TODO(synk): PyTorch promotes integer sums to int64; TPU has no
        # practical i64 path here, so accumulate & return int32 instead.
        out_dtype = jnp.int32
        acc_dtype = jnp.int32

    if not force_pallas and x.size * jnp.dtype(x.dtype).itemsize < (1 << 20):
        return jnp.sum(x, axis=1, keepdims=True, dtype=acc_dtype).astype(out_dtype)

    budget, vmem_limit = _tpu_budgets(block_budget_bytes)
    tn, tc, thw = _choose_tiles(n, c, hw, x.dtype, out_dtype, budget)

    x3 = x.reshape(n, c, hw)             # free: contiguous view, no HBM copy
    grid_n = pl.cdiv(n, tn)
    grid_hw = pl.cdiv(hw, thw)

    if tc >= c:
        # Common case: whole channel depth in one block, write output directly.
        out2 = pl.pallas_call(
            _make_direct_kernel(acc_dtype),
            out_shape=jax.ShapeDtypeStruct((n, hw), out_dtype),
            grid_spec=pltpu.PrefetchScalarGridSpec(
                num_scalar_prefetch=0,
                grid=(grid_n, grid_hw),
                in_specs=[pl.BlockSpec((tn, c, thw), lambda i, j: (i, 0, j))],
                out_specs=pl.BlockSpec((tn, thw), lambda i, j: (i, j)),
            ),
            compiler_params=pltpu.CompilerParams(
                dimension_semantics=("parallel", "parallel"),
                vmem_limit_bytes=vmem_limit,
            ),
        )(x3)
    else:
        # Deep C: tile the reduction over a trailing "arbitrary" grid axis with
        # an accumulator scratch (keeps lane-wide, VMEM-bounded blocks).
        grid_c = pl.cdiv(c, tc)
        out2 = pl.pallas_call(
            _make_tiled_c_kernel(c, tc),
            out_shape=jax.ShapeDtypeStruct((n, hw), out_dtype),
            grid_spec=pltpu.PrefetchScalarGridSpec(
                num_scalar_prefetch=0,
                grid=(grid_n, grid_hw, grid_c),
                in_specs=[pl.BlockSpec((tn, tc, thw), lambda i, j, k: (i, k, j))],
                out_specs=pl.BlockSpec((tn, thw), lambda i, j, k: (i, j)),
                scratch_shapes=[pltpu.VMEM((tn, thw), acc_dtype)],
            ),
            compiler_params=pltpu.CompilerParams(
                dimension_semantics=("parallel", "parallel", "arbitrary"),
                vmem_limit_bytes=vmem_limit,
            ),
        )(x3)

    return out2.reshape(n, 1, h, w)


if __name__ == "__main__":
    key = jax.random.PRNGKey(0)

    # Demo shape consistent with the module: (N, C, H, W) = (2, 4, 16, 16).
    n, c, h, w = 2, 4, 16, 16
    x = jax.random.normal(key, (n, c, h, w), dtype=jnp.float32)

    out = jax.block_until_ready(null_discriminator_forward(x, force_pallas=True))
    ref = jnp.sum(x, axis=1, keepdims=True)
    assert out.shape == (n, 1, h, w), out.shape
    assert out.dtype == x.dtype, out.dtype
    assert jnp.allclose(out, ref, atol=1e-6, rtol=1e-6), "mismatch vs reference"

    # Non-128-multiple spatial extent: exercises the no-pad / cdiv path where
    # the last lane block overhangs HW (OOB reads ignored, OOB writes dropped).
    x2 = jax.random.normal(jax.random.PRNGKey(1), (2, 4, 10, 10), dtype=jnp.float32)
    out2 = jax.block_until_ready(null_discriminator_forward(x2, force_pallas=True))
    ref2 = jnp.sum(x2, axis=1, keepdims=True)
    assert out2.shape == (2, 1, 10, 10), out2.shape
    assert jnp.allclose(out2, ref2, atol=1e-6, rtol=1e-6), "mismatch (overhang case)"

    # Force the channel-tiled reduction path with a tiny artificial block
    # budget (C=24 split into tiles of 16, last block masked).
    x3 = jax.random.normal(jax.random.PRNGKey(2), (2, 24, 16, 16), dtype=jnp.float32)
    out3 = jax.block_until_ready(
        null_discriminator_forward(x3, force_pallas=True, block_budget_bytes=32 * 1024))
    ref3 = jnp.sum(x3, axis=1, keepdims=True)
    assert out3.shape == (2, 1, 16, 16), out3.shape
    assert jnp.allclose(out3, ref3, atol=1e-5, rtol=1e-5), "mismatch (tiled-C case)"

    print("KERNEL_OK")
</pallas_src>

<mosaic_0001>
module attributes {stable_mosaic.version = 11 : i64} {
  func.func @kernel(%arg0: i32, %arg1: i32, %arg2: memref<2x4x128xf32, #tpu.memory_space<vmem>>, %arg3: memref<2x128xf32, #tpu.memory_space<vmem>>) attributes {dimension_semantics = [#tpu.dimension_semantics<parallel>, #tpu.dimension_semantics<parallel>], iteration_bounds = array<i64: 1, 2>, scalar_prefetch = 0 : i64, scratch_operands = 0 : i64, tpu.core_type = #tpu.core_type<tc>, window_params = [{transform_indices = @transform_0, window_bounds = array<i64: 2, 4, 128>}, {transform_indices = @transform_1, window_bounds = array<i64: 2, 128>}]} {
    %c0 = arith.constant 0 : index
    %c0_0 = arith.constant 0 : index
    %c0_1 = arith.constant 0 : index
    %0 = vector.load %arg2[%c0, %c0_0, %c0_1] : memref<2x4x128xf32, #tpu.memory_space<vmem>>, vector<2x4x128xf32>
    %cst = arith.constant dense<0.000000e+00> : vector<2x128xf32>
    %1 = vector.multi_reduction <add>, %0, %cst [1] : vector<2x4x128xf32> to vector<2x128xf32>
    %c0_2 = arith.constant 0 : index
    %c0_3 = arith.constant 0 : index
    %2 = vector.load %arg3[%c0_2, %c0_3] : memref<2x128xf32, #tpu.memory_space<vmem>>, vector<2x128xf32>
    tpu.vector_store %arg3[%c0_2, %c0_3], %1 {strides = array<i32>} : memref<2x128xf32, #tpu.memory_space<vmem>>, vector<2x128xf32>,
    return
  }
  func.func @transform_0(%arg0: i32, %arg1: i32) -> (i32, i32, i32) {
    %c0_i32 = arith.constant 0 : i32
    %c0_i32_0 = arith.constant 0 : i32
    return %arg0, %c0_i32, %arg1 : i32, i32, i32
  }
  func.func @transform_1(%arg0: i32, %arg1: i32) -> (i32, i32) {
    %c0_i32 = arith.constant 0 : i32
    return %arg0, %arg1 : i32, i32
  }
}

</mosaic_0001>

<bundles_post_ra>
// kernel: tpu_custom_call.1
= control target key start
LH: loop header
LB: loop body
LE: loop exit
PB: predicated region body
PF: predicated region fallthrough
CT: control target
= control target key end

     0   :  { %6 = vsyncpa [#allocation3], 0  ;;  %s654_s0 = inlined_call_operand.hbm [shape: f32[2,4,256], index: 0, kind: input, shape index: {}]   ;;  %s655_s1 = inlined_call_operand.hbm [shape: f32[2,256], index: 1, kind: output, shape index: {}]  }
   0x1   :  { %8 = vsyncpa [#allocation3 + $0x1], 0 }
   0x2   :  { %9 = vsyncpa [#allocation4], 0 }
   0x3   :  { %11 = vsyncpa [#allocation4 + $0x1], 0  ;;  %s482_s6 = smov 0   ;;  %s484_s7 = smov 0  }
   0x4   :  { %s486_s8 = smov 0   ;;  %s488_s9 = smov 0  }
   0x5   :  { %s490_s10 = smov 0   ;;  %s492_s11 = smov 0  }
   0x6 LB: > { %s275_s12 = sadd.s32 4294967295, %s465_s11   ;;  %s276_s13 = sadd.s32 4294967294, %s465_s11   ;;  %s465_s11 = sphi %s492_s11, %s17_s11   ;;  %s461_s10 = sphi %s490_s10, %s669_s10   ;;  %s457_s9 = sphi %s488_s9, %s668_s9   ;;  %s453_s8 = sphi %s486_s8, %s667_s8   ;;  %s449_s7 = sphi %s484_s7, %s666_s7   ;;  %s445_s6 = sphi %s482_s6, %s665_s6  }
   0x7   : > { %s26_s14 = sadd.s32 1, %s461_s10  ;;  %s38_s15 = sadd.s32 1, %s453_s8 }
   0x8   : > { %p27_p0 = scmp.ge.s32.totalorder %s26_s14, 2  ;;  %p45_p1 = scmp.ne.s32.totalorder %s453_s8, %s449_s7 }
   0x9   : > { %p46_p2 = scmp.eq.s32.totalorder %s465_s11, 0  ;;  %p51_p3 = scmp.ne.s32.totalorder %s449_s7, %s445_s6 }
   0xa   : > { %s671_s14 = smov (%p27_p0, %s26_s14), 0  ;;  %p52_p5 = scmp.eq.s32.totalorder %s275_s12, 0 }
   0xb   : > { %p523_p4 = por %p46_p2, %p45_p1  ;;  %s34_s17 = ssub.s32 %s461_s10, %s671_s14 }
   0xc   : > { %p77_p6 = scmp.eq.s32.totalorder %s275_s12, 1  ;;  %p36_p7 = scmp.eq.s32.totalorder %s34_s17, 0 }
   0xd   : > { %p529_p8 = por %p52_p5, %p51_p3  ;;  %p83_p10 = scmp.eq.s32.totalorder %s276_s13, 1 }
   0xe   : > { %p533_p9 = por %p77_p6, %p45_p1  ;;  %p300_p13 = scmp.lt.s32.totalorder %s465_s11, 2 }
   0xf   : > { %s538_s20 = scalar_select %p36_p7, %s453_s8, %s38_s15  }
  0x10   : > { %s659_s19 = scalar_select %p533_p9, 1, 0 }
  0x11   : > { %p540_p11 = por %p83_p10, %p51_p3  ;;  %s103_s22 = sand.u32 1, %s453_s8  }
  0x12   : > { %s279_s23 = sshll.u32 %s103_s22, 3  ;;  %s280_s24 = sshll.u32 %s461_s10, 6 }
  0x13   : > { %s660_s21 = scalar_select %p540_p11, 1, 0 }
  0x14   : > { %s551_s27 = scalar_lea.hbm %s654_s0, %s280_s24  ;;  %s107_s28 = scalar_lea.vmem [#allocation2], %s279_s23 }
  0x15   : > { %s116_s29 = sshll.u32 %s107_s28, 4  ;;  %p557_p0 = pnand %p300_p13, %p523_p4  ;;  %s553_s29 = int_to_ptr.vmem [resolvable:$true] %s116_s29 }
  0x16   : > { %s561_s2 = scalar_lea.sflag [#allocation3], %s103_s22  ;;  %s353_s3 = scalar_lea.hbm %s551_s27, 128 }
  0x17   : > { %p354_p1 = scmp.ne.s32.totalorder %s551_s27, %s353_s3  ;;  %p355_p2 = pneg %p557_p0 }
  0x18   : > { %s358_s12 = scalar_lea.hbm %s654_s0, 256  ;;  %p359_p4 = scmp.lt.u32.totalorder %s551_s27, %s654_s0 }
  0x19   : > { %p356_p3 = pnand %p355_p2, %p354_p1  ;;  %p360_p6 = scmp.lt.u32.totalorder %s358_s12, %s353_s3 }
  0x1a   : > { %p362_p10 = scmp.lt.u32.totalorder %s353_s3, %s551_s27 }
  0x1b   : > { %p357_p5 = pneg %p356_p3  ;;  %p361_p7 = por %p360_p6, %p359_p4 }
  0x1d   : > { %p363_p13 = por %p362_p10, %p361_p7 }
  0x1f   : > { %p364_p12 = pnand %p363_p13, %p357_p5 }
  0x21   : > { %367 = shalt.err (!%p364_p12)
}
  0x22   : > { %s368_s16 = scalar_lea.vmem %s553_s29, 128  ;;  %s467_s17 = smov [#allocation2]  }
  0x23   : > { %p369_p1 = scmp.ne.s32.totalorder %s553_s29, %s368_s16  ;;  %s373_s22 = sshll.u32 %s467_s17, 4  ;;  %s374_s22 = int_to_ptr.vmem [resolvable:$false] %s373_s22 }
  0x24   : > { %s375_s23 = scalar_lea.vmem %s374_s22, 256  ;;  %p376_p9 = scmp.lt.s32.totalorder %s553_s29, %s374_s22 }
  0x25   : > { %p371_p3 = pnand %p369_p1, %p355_p2  ;;  %p377_p4 = scmp.lt.s32.totalorder %s375_s23, %s368_s16 }
  0x27   : > { %p372_p11 = pneg %p371_p3  ;;  %p378_p6 = por %p377_p4, %p376_p9 }
  0x29   : > { %p379_p7 = pnand %p378_p6, %p372_p11 }
  0x2b   : > { %382 = shalt.err (!%p379_p7)
}
  0x2c   : > { %s468_s24 = smov 128   ;;  %s469_s25 = smov 64  }
  0x2d   : > { %s470_s26 = smov 4   ;;  %p281_p12 = scmp.ge.s32.totalorder %s465_s11, 1 }
  0x2e   : > { %295 = dma.hbm_to_vmem [thread:$0]  (!%p557_p0), %s551_s27, 128, %s553_s29, %s561_s2, %s468_s24, %s469_s25, %s470_s26  }
  0x2f   : > { %p124_p2 = scmp.lt.s32.totalorder %s465_s11, 3 }
  0x31   : > { %p125_p5 = pnand %p281_p12, %p124_p2 }
  0x32   : > { %s592_s28 = sand.u32 (!%p125_p5), 1, %s449_s7  }
  0x33   : > { %128 = sbr.rel (%p125_p5) target bundleno = 88 (0x58), region = 24  ;;  %s282_s3 = sshll.u32 (!%p125_p5), %s592_s28, 3 }
  0x34   : > { %s131_s4 = scalar_lea.sflag (!%p125_p5), [#allocation3], %s592_s28  ;;  %s134_s5 = scalar_lea.vmem (!%p125_p5), [#allocation2], %s282_s3 }
  0x3a   : > { %436 = dma.done.wait (%p529_p8), %s131_s4, 128  }
  0x3b   : > { %438 = vsyncadd (%p529_p8), %s131_s4, 4294967168  ;;  %vm156_vm0 = vcmask 1043456   ;;  %v154_v0 = vld [vmem:[%s134_s5] sm:$0xf]  ;;  %v155_v1 = vld [vmem:[%s134_s5 + $0x4] sm:$0xf] }
  0x3c   : > { %v157_v2 = vsel %vm156_vm0, %v154_v0, 0.0  ;;  %v164_v3 = vsel %vm156_vm0, %v155_v1, 0.0  ;;  %s283_s27 = sshll.u32 %s592_s28, 1  ;;  %s285_s30 = sshll.u32 %s457_s9, 5  ;;  %vm173_vm1 = vcmask 1041409  }
  0x3d   : > { %v158_v4 = vrot.slane %v157_v2, 4  ;;  %v165_v5 = vrot.slane %v164_v3, 4  ;;  %s152_s18 = scalar_lea.vmem [#allocation5], %s283_s27  ;;  %s607_s13 = scalar_lea.hbm %s655_s1, %s285_s30 }
  0x3e   : > { %s193_s29 = sshll.u32 %s152_s18, 4  ;;  %s178_s15 = scalar_lea.sflag [#allocation4], %s592_s28  ;;  %s602_s29 = int_to_ptr.vmem [resolvable:$true] %s193_s29 }
  0x3f   : > { %v159_v6 = vadd.f32 %v158_v4, %v157_v2  ;;  %v166_v7 = vadd.f32 %v165_v5, %v164_v3  ;;  %s383_s16 = scalar_lea.vmem %s602_s29, 32  ;;  %p662_p9 = scmp.ne.s32.totalorder %s659_s19, 0 }
  0x40   : > { %p384_p8 = scmp.ne.s32.totalorder %s602_s29, %s383_s16  ;;  %s471_s9 = smov [#allocation5]  }
  0x41   : > { %v160_v8 = vrot.slane %v159_v6, 2  ;;  %v167_v9 = vrot.slane %v166_v7, 2  ;;  %s387_s17 = sshll.u32 %s471_s9, 4  ;;  %s388_s17 = int_to_ptr.vmem [resolvable:$false] %s387_s17 }
  0x42   : > { %p385_p11 = pnand %p384_p8, %p662_p9  ;;  %s389_s22 = scalar_lea.vmem %s388_s17, 64 }
  0x43   : > { %v161_v10 = vadd.f32 %v160_v8, %v159_v6  ;;  %v168_v11 = vadd.f32 %v167_v9, %v166_v7  ;;  %p390_p10 = scmp.lt.s32.totalorder %s602_s29, %s388_s17  ;;  %p391_p13 = scmp.lt.s32.totalorder %s389_s22, %s383_s16 }
  0x44   : > { %p386_p0 = pneg %p385_p11 }
  0x45   : > { %v162_v12 = vrot.slane %v161_v10, 1  ;;  %v169_v13 = vrot.slane %v168_v11, 1  ;;  %p392_p1 = por %p391_p13, %p390_p10 }
  0x47   : > { %v163_v14 = vadd.f32 %v162_v12, %v161_v10  ;;  %v170_v15 = vadd.f32 %v169_v13, %v168_v11  ;;  %p393_p3 = pnand %p392_p1, %p386_p0 }
  0x49   : > { %v174_v16 = vsel %vm173_vm1, %v170_v15, %v163_v14 }
  0x4a   : > { %176 = vst [vmem:[%s152_s18] sm:$0x3] %v174_v16 }
  0x4b   : > { %396 = shalt.err (!%p393_p3)
}
  0x4c   : > { %s397_s23 = scalar_lea.hbm %s607_s13, 32  ;;  %s401_s26 = scalar_lea.hbm %s655_s1, 64 }
  0x4d   : > { %p398_p4 = scmp.ne.s32.totalorder %s607_s13, %s397_s23  ;;  %p402_p12 = scmp.lt.u32.totalorder %s607_s13, %s655_s1 }
  0x4e   : > { %p403_p2 = scmp.lt.u32.totalorder %s401_s26, %s397_s23  ;;  %p405_p8 = scmp.lt.u32.totalorder %s397_s23, %s607_s13 }
  0x4f   : > { %p399_p6 = pnand %p398_p4, %p662_p9 }
  0x50   : > { %p404_p5 = por %p403_p2, %p402_p12 }
  0x51   : > { %p400_p7 = pneg %p399_p6 }
  0x52   : > { %p406_p11 = por %p405_p8, %p404_p5 }
  0x54   : > { %p407_p0 = pnand %p406_p11, %p400_p7 }
  0x56   : > { %410 = shalt.err (!%p407_p0)
}
  0x57   : > { %290 = dma.vmem_to_hbm [thread:$0]  (%p662_p9), %s602_s29, 32, %s607_s13, %s178_s15  }
  0x58 PF: > { %s205_s4 = sand.u32 1, %s445_s6   ;;  %p663_p10 = scmp.ne.s32.totalorder %s660_s21, 0 }
  0x59   : > { %p664_p13 = scmp.ge.s32.totalorder %s465_s11, 2  ;;  %s206_s5 = scalar_lea.sflag [#allocation4], %s205_s4 }
  0x5b   : > { %p297_p1 = pnand %p664_p13, %p663_p10 }
  0x5d   : > { %440 = dma.done.wait (!%p297_p1), %s206_s5, 32  }
  0x5e   : > { %442 = vsyncadd (!%p297_p1), %s206_s5, 4294967264  ;;  %s17_s11 = sadd.s32 1, %s465_s11   ;;  %s665_s6 = smov %s449_s7 }
  0x5f   : > { %p14_p3 = scmp.ge.s32.totalorder %s17_s11, 4   ;;  %s666_s7 = smov %s453_s8 }
  0x60   : > { %s667_s8 = smov %s538_s20  ;;  %s668_s9 = smov %s461_s10 }
  0x61   : > { %s669_s10 = smov %s671_s14  ;;  %16 = sbr.rel (!%p14_p3) target bundleno = 6 (0x6), region = 69 }
  0x68   :  { %211 = vsyncpa [#allocation3], 1 }
  0x69   :  { %213 = vsyncpa [#allocation3 + $0x1], 1 }
  0x6a   :  { %214 = vsyncpa [#allocation4], 1 }
  0x6b   :  { %216 = vsyncpa [#allocation4 + $0x1], 1 }

</bundles_post_ra>
